<compile_context>
chip_gen: v7x
topology: tpu7x:2x2x1
jax: 0.10.0
libtpu: 0.0.40
codegen_flags: <defaults>
</compile_context>

<pallas_src>
import functools

import jax
import jax.numpy as jnp
from jax.experimental import pallas as pl
from jax.experimental.pallas import tpu as pltpu


def _exp_log_kernel(p_ref, y_ref, out_ref, *,
                    gamma, valid_size, r_tile, apply_softmax, needs_mask):
    s = pl.program_id(1)

    @pl.when(s == 0)
    def _():
        out_ref[...] = jnp.zeros_like(out_ref)

    logits = p_ref[0].astype(jnp.float32)   # (C, R, 128) -- cast on-chip
    y = y_ref[0].astype(jnp.float32)        # (C, R, 128)

    if apply_softmax:
        # reductions over the leading C axis = C-1 elementwise VALU ops across planes
        m = jnp.max(logits, axis=0, keepdims=True)        # (1, R, 128)
        e = jnp.exp(logits - m)
        denom = jnp.sum(e, axis=0, keepdims=True)         # (1, R, 128)
        # hoisted divide: one reciprocal per spatial element, then a multiply
        p = e * pl.reciprocal(denom, approx=False)
    else:
        p = logits

    if needs_mask:
        # zero the padded spatial positions (softmax would give them 1/C mass each)
        base = s * (r_tile * 128)
        row = jax.lax.broadcasted_iota(jnp.int32, (r_tile, 128), 0)
        col = jax.lax.broadcasted_iota(jnp.int32, (r_tile, 128), 1)
        valid = ((base + row * 128 + col) < valid_size).astype(jnp.float32)
        p = p * valid[None]
        y = y * valid[None]   # defensive; padded y is already zero

    # TODO(synk): optional one-hot CE fast path (one log/pow per pixel instead of per
    # class) is not implemented because it is only exact for hard labels.
    pc = 0.01 + p * 0.98
    ce_pow = jnp.power(-jnp.log(pc), gamma)   # pc <= 0.99 so -log(pc) > 0

    C, R = y.shape[0], y.shape[1]

    def fold(x):
        # (C, R, 128) -> (C, R//8, 8, 128) -> sum over axis 1: pure vreg-wise adds
        return jnp.sum(x.reshape(C, R // 8, 8, 128), axis=1)

    # accumulate into the VMEM-resident output block (same block for all s of this n)
    out_ref[0, 0] += fold(y)           # sum y
    out_ref[0, 1] += fold(p)           # sum p
    out_ref[0, 2] += fold(y * p)       # sum y*p
    out_ref[0, 3] += fold(y * ce_pow)  # sum y*ce**gamma


def _plan_tiles(S, C, itemsize, target_block_bytes=4 << 20):
    """Pick R_tile (multiple of 8) and padded spatial size S_pad (= multiple of R_tile*128)."""
    r_total = -(-S // 128)
    r_max = max(8, (target_block_bytes // (C * 128 * itemsize)) // 8 * 8)
    if r_total <= r_max:
        r_tile = -(-r_total // 8) * 8
        return r_tile, r_tile * 128
    # try to find a divisor of r_total that is a multiple of 8 (no padding needed)
    if S % 128 == 0 and r_total % 8 == 0:
        best = 0
        d = 1
        while d * d <= r_total:
            if r_total % d == 0:
                for cand in (d, r_total // d):
                    if cand % 8 == 0 and cand <= r_max and cand > best:
                        best = cand
            d += 1
        if best:
            return best, S
    r_tile = r_max
    s_pad = -(-S // (r_tile * 128)) * (r_tile * 128)
    return r_tile, s_pad


def exp_log_loss(predict, soft_y, *, w_dice=0.8, gamma=0.3, softmax=True):
    """Pallas implementation of ExpLogLoss.forward.

    predict, soft_y: (N, C, *spatial) float arrays of identical shape.
    Returns a scalar float32 loss.
    """
    if isinstance(predict, (list, tuple)):
        predict = predict[0]

    N, C = int(predict.shape[0]), int(predict.shape[1])
    S = 1
    for d in predict.shape[2:]:
        S *= int(d)

    # TODO(synk): integer-label / bf16 ground-truth input path (halves the HBM stream
    # on v5e/v6e) is not implemented; soft_y is consumed as a dense tensor per the spec.
    itemsize = jnp.dtype(predict.dtype).itemsize
    r_tile, s_pad = _plan_tiles(S, C, itemsize)
    needs_mask = (s_pad != S)

    # pure reshapes (plus zero-pad only when S is not tile-divisible); no transpose,
    # no dtype pre-cast (the kernel casts on-chip)
    p3 = predict.reshape(N, C, S)
    y3 = soft_y.reshape(N, C, S)
    if needs_mask:
        pad = ((0, 0), (0, 0), (0, s_pad - S))
        p3 = jnp.pad(p3, pad)
        y3 = jnp.pad(y3, pad)
    r_pad = s_pad // 128
    p4 = p3.reshape(N, C, r_pad, 128)
    y4 = y3.reshape(N, C, r_pad, 128)

    grid = (N, r_pad // r_tile)

    kernel = functools.partial(
        _exp_log_kernel,
        gamma=float(gamma),
        valid_size=S,
        r_tile=r_tile,
        apply_softmax=bool(softmax),
        needs_mask=needs_mask,
    )

    # explicit VMEM budget: 2 inputs x 2 pipeline buffers + output block + headroom
    in_block_bytes = C * r_tile * 128 * itemsize
    out_block_bytes = 4 * C * 8 * 128 * 4
    vmem_needed = 4 * in_block_bytes + 2 * out_block_bytes + (2 << 20)
    vmem_limit = int(min(max(2 * vmem_needed, 24 << 20), 56 << 20))

    partials = pl.pallas_call(
        kernel,
        out_shape=jax.ShapeDtypeStruct((N, 4, C, 8, 128), jnp.float32),
        grid_spec=pltpu.PrefetchScalarGridSpec(
            num_scalar_prefetch=0,
            grid=grid,
            in_specs=[
                pl.BlockSpec((1, C, r_tile, 128), lambda n, s: (n, 0, s, 0)),
                pl.BlockSpec((1, C, r_tile, 128), lambda n, s: (n, 0, s, 0)),
            ],
            out_specs=pl.BlockSpec((1, 4, C, 8, 128),
                                   lambda n, s: (n, 0, 0, 0, 0)),
        ),
        compiler_params=pltpu.CompilerParams(
            dimension_semantics=("parallel", "arbitrary"),
            vmem_limit_bytes=vmem_limit),
    )(p4, y4)

    # tiny finalization epilogue (O(C) work) in plain JAX
    total = float(N * S)
    sums = jnp.sum(partials, axis=(0, 3, 4))     # (4, C)
    y_vol, p_vol, inter, ce_sum = sums[0], sums[1], sums[2], sums[3]

    dice = (2.0 * inter + 1e-5) / (y_vol + p_vol + 1e-5)
    dice = 0.01 + dice * 0.98
    exp_dice = jnp.mean(jnp.power(-jnp.log(dice), gamma))

    wc = jnp.power(1.0 / (y_vol / total + 0.1), 0.5)
    exp_ce = jnp.sum(wc * ce_sum) / total

    return exp_dice * w_dice + exp_ce * (1.0 - w_dice)


def exp_log_loss_ref(predict, soft_y, *, w_dice=0.8, gamma=0.3, softmax=True):
    """Pure-JAX reference mirroring the PyTorch forward."""
    if softmax:
        predict = jax.nn.softmax(predict, axis=1)
    N, C = predict.shape[0], predict.shape[1]
    p2 = jnp.moveaxis(predict, 1, -1).reshape(-1, C)
    y2 = jnp.moveaxis(soft_y, 1, -1).reshape(-1, C)

    y_vol = jnp.sum(y2, axis=0)
    p_vol = jnp.sum(p2, axis=0)
    inter = jnp.sum(y2 * p2, axis=0)
    dice = (2.0 * inter + 1e-5) / (y_vol + p_vol + 1e-5)
    dice = 0.01 + dice * 0.98
    exp_dice = jnp.mean(jnp.power(-jnp.log(dice), gamma))

    pc = 0.01 + p2 * 0.98
    wc = jnp.mean(y2, axis=0)
    wc = jnp.power(1.0 / (wc + 0.1), 0.5)
    ce = -jnp.log(pc)
    exp_ce = jnp.mean(jnp.sum(y2 * (wc * jnp.power(ce, gamma)), axis=1))
    return exp_dice * w_dice + exp_ce * (1.0 - w_dice)


if __name__ == "__main__":
    # ExpLogLoss has no weights, only these two hyper-parameters from its params dict
    W_DICE = 0.8
    GAMMA = 0.3

    key = jax.random.PRNGKey(0)
    k1, k2 = jax.random.split(key)

    N, C, H, W = 2, 4, 16, 16
    predict = jax.random.normal(k1, (N, C, H, W), dtype=jnp.float32)
    labels = jax.random.randint(k2, (N, H, W), 0, C)
    soft_y = jax.nn.one_hot(labels, C, dtype=jnp.float32)          # NHWC
    soft_y = jnp.transpose(soft_y, (0, 3, 1, 2))                   # -> NCHW

    loss = exp_log_loss(predict, soft_y, w_dice=W_DICE, gamma=GAMMA,
                        softmax=True)
    loss = jax.block_until_ready(loss)

    ref = exp_log_loss_ref(predict, soft_y, w_dice=W_DICE, gamma=GAMMA,
                           softmax=True)
    ref = jax.block_until_ready(ref)

    assert jnp.allclose(loss, ref, rtol=1e-4, atol=1e-5), (loss, ref)
    print("KERNEL_OK")
</pallas_src>

<mosaic_0001>
module attributes {stable_mosaic.version = 11 : i64} {
  func.func @_exp_log_kernel(%arg0: i32, %arg1: i32, %arg2: memref<1x4x8x128xf32, #tpu.memory_space<vmem>>, %arg3: memref<1x4x8x128xf32, #tpu.memory_space<vmem>>, %arg4: memref<1x4x4x8x128xf32, #tpu.memory_space<vmem>>) attributes {dimension_semantics = [#tpu.dimension_semantics<parallel>, #tpu.dimension_semantics<arbitrary>], iteration_bounds = array<i64: 2, 1>, scalar_prefetch = 0 : i64, scratch_operands = 0 : i64, tpu.core_type = #tpu.core_type<tc>, window_params = [{transform_indices = @transform_0, window_bounds = array<i64: 1, 4, 8, 128>}, {transform_indices = @transform_1, window_bounds = array<i64: 1, 4, 8, 128>}, {transform_indices = @transform_2, window_bounds = array<i64: 1, 4, 4, 8, 128>}]} {
    %c0_i32 = arith.constant 0 : i32
    %0 = arith.cmpi eq, %arg1, %c0_i32 : i32
    %1 = arith.extui %0 : i1 to i32
    %c0_i32_0 = arith.constant 0 : i32
    %2 = arith.cmpi ne, %1, %c0_i32_0 : i32
    scf.if %2 {
      %cst_54 = arith.constant 0.000000e+00 : f32
      %78 = vector.broadcast %cst_54 : f32 to vector<1x4x4x8x128xf32>
      %c0_55 = arith.constant 0 : index
      %c0_56 = arith.constant 0 : index
      %c0_57 = arith.constant 0 : index
      %c0_58 = arith.constant 0 : index
      %c0_59 = arith.constant 0 : index
      %79 = vector.load %arg4[%c0_55, %c0_56, %c0_57, %c0_58, %c0_59] : memref<1x4x4x8x128xf32, #tpu.memory_space<vmem>>, vector<1x4x4x8x128xf32>
      tpu.vector_store %arg4[%c0_55, %c0_56, %c0_57, %c0_58, %c0_59], %78 {strides = array<i32>} : memref<1x4x4x8x128xf32, #tpu.memory_space<vmem>>, vector<1x4x4x8x128xf32>,
    } else {
    }
    %c0 = arith.constant 0 : index
    %c0_1 = arith.constant 0 : index
    %c0_2 = arith.constant 0 : index
    %c0_3 = arith.constant 0 : index
    %3 = vector.load %arg2[%c0, %c0_1, %c0_2, %c0_3] : memref<1x4x8x128xf32, #tpu.memory_space<vmem>>, vector<1x4x8x128xf32>
    %4 = vector.shape_cast %3 : vector<1x4x8x128xf32> to vector<4x8x128xf32>
    %c0_4 = arith.constant 0 : index
    %c0_5 = arith.constant 0 : index
    %c0_6 = arith.constant 0 : index
    %c0_7 = arith.constant 0 : index
    %5 = vector.load %arg3[%c0_4, %c0_5, %c0_6, %c0_7] : memref<1x4x8x128xf32, #tpu.memory_space<vmem>>, vector<1x4x8x128xf32>
    %6 = vector.shape_cast %5 : vector<1x4x8x128xf32> to vector<4x8x128xf32>
    %cst = arith.constant dense<0xFF800000> : vector<8x128xf32>
    %7 = vector.multi_reduction <maximumf>, %4, %cst [0] : vector<4x8x128xf32> to vector<8x128xf32>
    %8 = vector.shape_cast %7 : vector<8x128xf32> to vector<1x8x128xf32>
    %9 = vector.broadcast %8 : vector<1x8x128xf32> to vector<4x8x128xf32>
    %10 = arith.subf %4, %9 : vector<4x8x128xf32>
    %11 = math.exp %10 : vector<4x8x128xf32>
    %cst_8 = arith.constant dense<0.000000e+00> : vector<8x128xf32>
    %12 = vector.multi_reduction <add>, %11, %cst_8 [0] : vector<4x8x128xf32> to vector<8x128xf32>
    %13 = vector.shape_cast %12 : vector<8x128xf32> to vector<1x8x128xf32>
    %14 = tpu.reciprocal %13 : vector<1x8x128xf32> -> vector<1x8x128xf32>
    %15 = vector.broadcast %14 : vector<1x8x128xf32> to vector<4x8x128xf32>
    %16 = arith.mulf %11, %15 : vector<4x8x128xf32>
    %c1024_i32 = arith.constant 1024 : i32
    %17 = arith.muli %arg1, %c1024_i32 : i32
    %18 = tpu.iota {dimensions = array<i32: 0>} : vector<8x128xi32>
    %19 = tpu.iota {dimensions = array<i32: 1>} : vector<8x128xi32>
    %c128_i32 = arith.constant 128 : i32
    %20 = vector.broadcast %c128_i32 : i32 to vector<8x128xi32>
    %21 = arith.muli %18, %20 : vector<8x128xi32>
    %22 = vector.broadcast %17 : i32 to vector<8x128xi32>
    %23 = arith.addi %22, %21 : vector<8x128xi32>
    %24 = arith.addi %23, %19 : vector<8x128xi32>
    %c256_i32 = arith.constant 256 : i32
    %25 = vector.broadcast %c256_i32 : i32 to vector<8x128xi32>
    %26 = arith.cmpi slt, %24, %25 : vector<8x128xi32>
    %27 = arith.extui %26 : vector<8x128xi1> to vector<8x128xi32>
    %28 = arith.sitofp %27 : vector<8x128xi32> to vector<8x128xf32>
    %29 = vector.shape_cast %28 : vector<8x128xf32> to vector<1x8x128xf32>
    %30 = vector.broadcast %29 : vector<1x8x128xf32> to vector<4x8x128xf32>
    %31 = arith.mulf %16, %30 : vector<4x8x128xf32>
    %32 = vector.shape_cast %28 : vector<8x128xf32> to vector<1x8x128xf32>
    %33 = vector.broadcast %32 : vector<1x8x128xf32> to vector<4x8x128xf32>
    %34 = arith.mulf %6, %33 : vector<4x8x128xf32>
    %cst_9 = arith.constant 9.800000e-01 : f32
    %35 = vector.broadcast %cst_9 : f32 to vector<4x8x128xf32>
    %36 = arith.mulf %31, %35 : vector<4x8x128xf32>
    %cst_10 = arith.constant 0.00999999977 : f32
    %37 = vector.broadcast %cst_10 : f32 to vector<4x8x128xf32>
    %38 = arith.addf %37, %36 : vector<4x8x128xf32>
    %39 = math.log %38 : vector<4x8x128xf32>
    %cst_11 = arith.constant 0.000000e+00 : f32
    %40 = vector.broadcast %cst_11 : f32 to vector<4x8x128xf32>
    %41 = arith.subf %40, %39 : vector<4x8x128xf32>
    %cst_12 = arith.constant 3.000000e-01 : f32
    %42 = vector.broadcast %cst_12 : f32 to vector<4x8x128xf32>
    %43 = math.powf %41, %42 : vector<4x8x128xf32>
    %c0_13 = arith.constant 0 : index
    %c0_14 = arith.constant 0 : index
    %c0_15 = arith.constant 0 : index
    %c0_16 = arith.constant 0 : index
    %c0_17 = arith.constant 0 : index
    %44 = vector.load %arg4[%c0_13, %c0_14, %c0_15, %c0_16, %c0_17] : memref<1x4x4x8x128xf32, #tpu.memory_space<vmem>>, vector<1x1x4x8x128xf32>
    %45 = vector.shape_cast %44 : vector<1x1x4x8x128xf32> to vector<4x8x128xf32>
    %46 = vector.shape_cast %34 : vector<4x8x128xf32> to vector<4x1x8x128xf32>
    %cst_18 = arith.constant dense<0.000000e+00> : vector<4x8x128xf32>
    %47 = vector.multi_reduction <add>, %46, %cst_18 [1] : vector<4x1x8x128xf32> to vector<4x8x128xf32>
    %48 = arith.addf %45, %47 : vector<4x8x128xf32>
    %c0_19 = arith.constant 0 : index
    %c0_20 = arith.constant 0 : index
    %c0_21 = arith.constant 0 : index
    %c0_22 = arith.constant 0 : index
    %c0_23 = arith.constant 0 : index
    %49 = vector.load %arg4[%c0_19, %c0_20, %c0_21, %c0_22, %c0_23] : memref<1x4x4x8x128xf32, #tpu.memory_space<vmem>>, vector<1x1x4x8x128xf32>
    %50 = vector.shape_cast %49 : vector<1x1x4x8x128xf32> to vector<4x8x128xf32>
    %51 = vector.shape_cast %48 : vector<4x8x128xf32> to vector<1x1x4x8x128xf32>
    tpu.vector_store %arg4[%c0_19, %c0_20, %c0_21, %c0_22, %c0_23], %51 {strides = array<i32>} : memref<1x4x4x8x128xf32, #tpu.memory_space<vmem>>, vector<1x1x4x8x128xf32>,
    %c0_24 = arith.constant 0 : index
    %c1 = arith.constant 1 : index
    %c0_25 = arith.constant 0 : index
    %c0_26 = arith.constant 0 : index
    %c0_27 = arith.constant 0 : index
    %52 = vector.load %arg4[%c0_24, %c1, %c0_25, %c0_26, %c0_27] : memref<1x4x4x8x128xf32, #tpu.memory_space<vmem>>, vector<1x1x4x8x128xf32>
    %53 = vector.shape_cast %52 : vector<1x1x4x8x128xf32> to vector<4x8x128xf32>
    %54 = vector.shape_cast %31 : vector<4x8x128xf32> to vector<4x1x8x128xf32>
    %cst_28 = arith.constant dense<0.000000e+00> : vector<4x8x128xf32>
    %55 = vector.multi_reduction <add>, %54, %cst_28 [1] : vector<4x1x8x128xf32> to vector<4x8x128xf32>
    %56 = arith.addf %53, %55 : vector<4x8x128xf32>
    %c0_29 = arith.constant 0 : index
    %c1_30 = arith.constant 1 : index
    %c0_31 = arith.constant 0 : index
    %c0_32 = arith.constant 0 : index
    %c0_33 = arith.constant 0 : index
    %57 = vector.load %arg4[%c0_29, %c1_30, %c0_31, %c0_32, %c0_33] : memref<1x4x4x8x128xf32, #tpu.memory_space<vmem>>, vector<1x1x4x8x128xf32>
    %58 = vector.shape_cast %57 : vector<1x1x4x8x128xf32> to vector<4x8x128xf32>
    %59 = vector.shape_cast %56 : vector<4x8x128xf32> to vector<1x1x4x8x128xf32>
    tpu.vector_store %arg4[%c0_29, %c1_30, %c0_31, %c0_32, %c0_33], %59 {strides = array<i32>} : memref<1x4x4x8x128xf32, #tpu.memory_space<vmem>>, vector<1x1x4x8x128xf32>,
    %c0_34 = arith.constant 0 : index
    %c2 = arith.constant 2 : index
    %c0_35 = arith.constant 0 : index
    %c0_36 = arith.constant 0 : index
    %c0_37 = arith.constant 0 : index
    %60 = vector.load %arg4[%c0_34, %c2, %c0_35, %c0_36, %c0_37] : memref<1x4x4x8x128xf32, #tpu.memory_space<vmem>>, vector<1x1x4x8x128xf32>
    %61 = vector.shape_cast %60 : vector<1x1x4x8x128xf32> to vector<4x8x128xf32>
    %62 = arith.mulf %34, %31 : vector<4x8x128xf32>
    %63 = vector.shape_cast %62 : vector<4x8x128xf32> to vector<4x1x8x128xf32>
    %cst_38 = arith.constant dense<0.000000e+00> : vector<4x8x128xf32>
    %64 = vector.multi_reduction <add>, %63, %cst_38 [1] : vector<4x1x8x128xf32> to vector<4x8x128xf32>
    %65 = arith.addf %61, %64 : vector<4x8x128xf32>
    %c0_39 = arith.constant 0 : index
    %c2_40 = arith.constant 2 : index
    %c0_41 = arith.constant 0 : index
    %c0_42 = arith.constant 0 : index
    %c0_43 = arith.constant 0 : index
    %66 = vector.load %arg4[%c0_39, %c2_40, %c0_41, %c0_42, %c0_43] : memref<1x4x4x8x128xf32, #tpu.memory_space<vmem>>, vector<1x1x4x8x128xf32>
    %67 = vector.shape_cast %66 : vector<1x1x4x8x128xf32> to vector<4x8x128xf32>
    %68 = vector.shape_cast %65 : vector<4x8x128xf32> to vector<1x1x4x8x128xf32>
    tpu.vector_store %arg4[%c0_39, %c2_40, %c0_41, %c0_42, %c0_43], %68 {strides = array<i32>} : memref<1x4x4x8x128xf32, #tpu.memory_space<vmem>>, vector<1x1x4x8x128xf32>,
    %c0_44 = arith.constant 0 : index
    %c3 = arith.constant 3 : index
    %c0_45 = arith.constant 0 : index
    %c0_46 = arith.constant 0 : index
    %c0_47 = arith.constant 0 : index
    %69 = vector.load %arg4[%c0_44, %c3, %c0_45, %c0_46, %c0_47] : memref<1x4x4x8x128xf32, #tpu.memory_space<vmem>>, vector<1x1x4x8x128xf32>
    %70 = vector.shape_cast %69 : vector<1x1x4x8x128xf32> to vector<4x8x128xf32>
    %71 = arith.mulf %34, %43 : vector<4x8x128xf32>
    %72 = vector.shape_cast %71 : vector<4x8x128xf32> to vector<4x1x8x128xf32>
    %cst_48 = arith.constant dense<0.000000e+00> : vector<4x8x128xf32>
    %73 = vector.multi_reduction <add>, %72, %cst_48 [1] : vector<4x1x8x128xf32> to vector<4x8x128xf32>
    %74 = arith.addf %70, %73 : vector<4x8x128xf32>
    %c0_49 = arith.constant 0 : index
    %c3_50 = arith.constant 3 : index
    %c0_51 = arith.constant 0 : index
    %c0_52 = arith.constant 0 : index
    %c0_53 = arith.constant 0 : index
    %75 = vector.load %arg4[%c0_49, %c3_50, %c0_51, %c0_52, %c0_53] : memref<1x4x4x8x128xf32, #tpu.memory_space<vmem>>, vector<1x1x4x8x128xf32>
    %76 = vector.shape_cast %75 : vector<1x1x4x8x128xf32> to vector<4x8x128xf32>
    %77 = vector.shape_cast %74 : vector<4x8x128xf32> to vector<1x1x4x8x128xf32>
    tpu.vector_store %arg4[%c0_49, %c3_50, %c0_51, %c0_52, %c0_53], %77 {strides = array<i32>} : memref<1x4x4x8x128xf32, #tpu.memory_space<vmem>>, vector<1x1x4x8x128xf32>,
    return
  }
  func.func @transform_0(%arg0: i32, %arg1: i32) -> (i32, i32, i32, i32) {
    %c0_i32 = arith.constant 0 : i32
    %c0_i32_0 = arith.constant 0 : i32
    %c0_i32_1 = arith.constant 0 : i32
    return %arg0, %c0_i32, %arg1, %c0_i32_0 : i32, i32, i32, i32
  }
  func.func @transform_1(%arg0: i32, %arg1: i32) -> (i32, i32, i32, i32) {
    %c0_i32 = arith.constant 0 : i32
    %c0_i32_0 = arith.constant 0 : i32
    %c0_i32_1 = arith.constant 0 : i32
    return %arg0, %c0_i32, %arg1, %c0_i32_0 : i32, i32, i32, i32
  }
  func.func @transform_2(%arg0: i32, %arg1: i32) -> (i32, i32, i32, i32, i32) {
    %c0_i32 = arith.constant 0 : i32
    %c0_i32_0 = arith.constant 0 : i32
    %c0_i32_1 = arith.constant 0 : i32
    %c0_i32_2 = arith.constant 0 : i32
    %c0_i32_3 = arith.constant 0 : i32
    return %arg0, %c0_i32, %c0_i32_0, %c0_i32_1, %c0_i32_2 : i32, i32, i32, i32, i32
  }
}

</mosaic_0001>

<bundles_post_ra>
// kernel: tpu_custom_call.1
= control target key start
LH: loop header
LB: loop body
LE: loop exit
PB: predicated region body
PF: predicated region fallthrough
CT: control target
= control target key end

     0   :  { %7 = vsyncpa [#allocation3], 0  ;;  %s1268_s0 = inlined_call_operand.hbm [shape: f32[2,4,8,128], index: 0, kind: input, shape index: {}]   ;;  %s1269_s1 = inlined_call_operand.hbm [shape: f32[2,4,8,128], index: 1, kind: input, shape index: {}]   ;;  %s1270_s2 = inlined_call_operand.hbm [shape: f32[2,4,4,8,128], index: 2, kind: output, shape index: {}]  }
   0x1   :  { %9 = vsyncpa [#allocation3 + $0x1], 0 }
   0x2   :  { %10 = vsyncpa [#allocation6], 0 }
   0x3   :  { %12 = vsyncpa [#allocation6 + $0x1], 0 }
   0x4   :  { %13 = vsyncpa [#allocation4], 0 }
   0x5   :  { %15 = vsyncpa [#allocation4 + $0x1], 0  ;;  %s940_s9 = smov 0   ;;  %s942_s10 = smov 0  }
   0x6   :  { %s944_s11 = smov 0   ;;  %s946_s12 = smov 0  }
   0x7   :  { %s948_s13 = smov 0   ;;  %s950_s14 = smov 0  }
   0x8 LB: > { %s512_s15 = sadd.s32 4294967295, %s915_s14   ;;  %s513_s16 = sadd.s32 4294967294, %s915_s14   ;;  %s915_s14 = sphi %s950_s14, %s21_s14   ;;  %s911_s13 = sphi %s948_s13, %s1294_s13   ;;  %s907_s12 = sphi %s946_s12, %s1293_s12   ;;  %s903_s11 = sphi %s944_s11, %s1292_s11   ;;  %s899_s10 = sphi %s942_s10, %s1291_s10   ;;  %s895_s9 = sphi %s940_s9, %s1290_s9  }
   0x9   : > { %s33_s17 = sadd.s32 1, %s911_s13  ;;  %s42_s18 = sadd.s32 1, %s903_s11 }
   0xa   : > { %p35_p0 = scmp.ge.s32.totalorder %s33_s17, 2  ;;  %p49_p1 = scmp.ne.s32.totalorder %s903_s11, %s899_s10 }
   0xb   : > { %p50_p2 = scmp.eq.s32.totalorder %s915_s14, 0  ;;  %p55_p3 = scmp.ne.s32.totalorder %s899_s10, %s895_s9 }
   0xc   : > { %s1296_s17 = smov (%p35_p0, %s33_s17), 0  ;;  %p56_p5 = scmp.eq.s32.totalorder %s512_s15, 0 }
   0xd   : > { %p981_p4 = por %p50_p2, %p49_p1  ;;  %s37_s20 = ssub.s32 %s911_s13, %s1296_s17 }
   0xe   : > { %p107_p6 = scmp.eq.s32.totalorder %s512_s15, 1  ;;  %p40_p7 = scmp.eq.s32.totalorder %s37_s20, 0 }
   0xf   : > { %p987_p8 = por %p56_p5, %p55_p3  ;;  %p113_p10 = scmp.eq.s32.totalorder %s513_s16, 1 }
  0x10   : > { %p991_p9 = por %p107_p6, %p49_p1  ;;  %p680_p13 = scmp.lt.s32.totalorder %s915_s14, 2 }
  0x11   : > { %s1274_s21 = scalar_select %p987_p8, 1, 0 }
  0x12   : > { %s1275_s22 = scalar_select %p991_p9, 1, 0 }
  0x13   : > { %s996_s23 = scalar_select %p40_p7, %s903_s11, %s42_s18  }
  0x14   : > { %p998_p11 = por %p113_p10, %p55_p3  ;;  %s1005_s25 = sand.u32 1, %s903_s11  }
  0x15   : > { %s516_s26 = sshll.u32 %s1005_s25, 5  ;;  %s556_s27 = sshll.u32 %s911_s13, 9 }
  0x16   : > { %s1276_s24 = scalar_select %p998_p11, 1, 0 }
  0x17   : > { %s1014_s30 = scalar_lea.hbm %s1268_s0, %s556_s27  ;;  %s137_s3 = scalar_lea.vmem [#allocation2], %s516_s26 }
  0x18   : > { %s145_s4 = sshll.u32 %s137_s3, 4  ;;  %p1022_p0 = pnand %p680_p13, %p981_p4  ;;  %s1018_s4 = int_to_ptr.vmem [resolvable:$true] %s145_s4 }
  0x19   : > { %s134_s6 = scalar_lea.sflag [#allocation3], %s1005_s25  ;;  %s769_s7 = scalar_lea.hbm %s1014_s30, 512 }
  0x1a   : > { %p770_p2 = scmp.ne.s32.totalorder %s1014_s30, %s769_s7  ;;  %p771_p3 = pneg %p1022_p0 }
  0x1b   : > { %s774_s16 = scalar_lea.hbm %s1268_s0, 1024  ;;  %p775_p4 = scmp.lt.u32.totalorder %s1014_s30, %s1268_s0 }
  0x1c   : > { %p772_p5 = pnand %p771_p3, %p770_p2  ;;  %p776_p7 = scmp.lt.u32.totalorder %s774_s16, %s769_s7 }
  0x1d   : > { %p778_p13 = scmp.lt.u32.totalorder %s769_s7, %s1014_s30 }
  0x1e   : > { %p773_p6 = pneg %p772_p5  ;;  %p777_p10 = por %p776_p7, %p775_p4 }
  0x20   : > { %p779_p12 = por %p778_p13, %p777_p10 }
  0x22   : > { %p780_p1 = pnand %p779_p12, %p773_p6 }
  0x24   : > { %783 = shalt.err (!%p780_p1)
}
  0x25   : > { %s784_s20 = scalar_lea.vmem %s1018_s4, 512  ;;  %s917_s28 = smov [#allocation2]  }
  0x26   : > { %p785_p2 = scmp.ne.s32.totalorder %s1018_s4, %s784_s20  ;;  %s789_s29 = sshll.u32 %s917_s28, 4  ;;  %s790_s29 = int_to_ptr.vmem [resolvable:$false] %s789_s29 }
  0x27   : > { %s791_s3 = scalar_lea.vmem %s790_s29, 1024  ;;  %p792_p9 = scmp.lt.s32.totalorder %s1018_s4, %s790_s29 }
  0x28   : > { %p787_p5 = pnand %p785_p2, %p771_p3  ;;  %p793_p4 = scmp.lt.s32.totalorder %s791_s3, %s784_s20 }
  0x2a   : > { %p788_p11 = pneg %p787_p5  ;;  %p794_p7 = por %p793_p4, %p792_p9 }
  0x2c   : > { %p795_p10 = pnand %p794_p7, %p788_p11 }
  0x2e   : > { %798 = shalt.err (!%p795_p10)
}
  0x2f   : > { %s918_s7 = smov 128   ;;  %s919_s8 = smov 8  }
  0x30   : > { %672 = dma.hbm_to_vmem [thread:$0]  (!%p1022_p0), %s1014_s30, 512, %s1018_s4, %s134_s6, %s918_s7, %s918_s7, %s919_s8  }
  0x31   : > { %p175_p9 = scmp.lt.s32.totalorder %s915_s14, 3  ;;  %s1064_s18 = scalar_lea.hbm %s1269_s1, %s556_s27 }
  0x32   : > { %p1278_p11 = scmp.ge.s32.totalorder %s915_s14, 1  ;;  %s159_s20 = scalar_lea.vmem [#allocation5], %s516_s26 }
  0x33   : > { %s167_s28 = sshll.u32 %s159_s20, 4  ;;  %s156_s30 = scalar_lea.sflag [#allocation6], %s1005_s25  ;;  %s1074_s28 = int_to_ptr.vmem [resolvable:$true] %s167_s28 }
  0x34   : > { %p1068_p12 = pnand %p1278_p11, %p175_p9  ;;  %s799_s4 = scalar_lea.hbm %s1064_s18, 512 }
  0x35   : > { %p800_p1 = scmp.ne.s32.totalorder %s1064_s18, %s799_s4  ;;  %s804_s29 = scalar_lea.hbm %s1269_s1, 1024 }
  0x36   : > { %p805_p2 = scmp.lt.u32.totalorder %s1064_s18, %s1269_s1  ;;  %p806_p5 = scmp.lt.u32.totalorder %s804_s29, %s799_s4 }
  0x37   : > { %p802_p6 = pnand %p800_p1, %p771_p3  ;;  %p808_p7 = scmp.lt.u32.totalorder %s799_s4, %s1064_s18 }
  0x38   : > { %p807_p4 = por %p806_p5, %p805_p2 }
  0x39   : > { %p803_p13 = pneg %p802_p6 }
  0x3a   : > { %p809_p10 = por %p808_p7, %p807_p4 }
  0x3c   : > { %p810_p9 = pnand %p809_p10, %p803_p13 }
  0x3e   : > { %813 = shalt.err (!%p810_p9)
}
  0x3f   : > { %s814_s26 = scalar_lea.vmem %s1074_s28, 512  ;;  %s920_s16 = smov [#allocation5]  }
  0x40   : > { %p815_p11 = scmp.ne.s32.totalorder %s1074_s28, %s814_s26  ;;  %s819_s20 = sshll.u32 %s920_s16, 4  ;;  %s820_s20 = int_to_ptr.vmem [resolvable:$false] %s819_s20 }
  0x41   : > { %s821_s27 = scalar_lea.vmem %s820_s20, 1024  ;;  %p822_p8 = scmp.lt.s32.totalorder %s1074_s28, %s820_s20 }
  0x42   : > { %p817_p1 = pnand %p815_p11, %p771_p3  ;;  %p823_p2 = scmp.lt.s32.totalorder %s821_s27, %s814_s26 }
  0x44   : > { %p818_p6 = pneg %p817_p1  ;;  %p824_p5 = por %p823_p2, %p822_p8 }
  0x46   : > { %p825_p4 = pnand %p824_p5, %p818_p6 }
  0x48   : > { %828 = shalt.err (!%p825_p4)
}
  0x49   : > { %675 = dma.hbm_to_vmem [thread:$0]  (!%p1022_p0), %s1064_s18, 512, %s1074_s28, %s156_s30, %s918_s7, %s918_s7, %s919_s8  }
  0x4a   : > { %179 = sbr.rel (%p1068_p12) target bundleno = 199 (0xc7), region = 28  ;;  %s1108_s4 = sand.u32 (!%p1068_p12), 1, %s899_s10  }
  0x4b   : > { %s523_s6 = sshll.u32 (!%p1068_p12), %s1108_s4, 5  ;;  %s182_s29 = scalar_lea.sflag (!%p1068_p12), [#allocation3], %s1108_s4 }
  0x4c   : > { %s185_s5 = scalar_lea.vmem (!%p1068_p12), [#allocation2], %s523_s6  ;;  %p1280_p8 = scmp.ne.s32.totalorder (!%p1068_p12), %s1274_s21, 0 }
  0x51   : > { %882 = dma.done.wait (%p1280_p8), %s182_s29, 512  }
  0x52   : > { %884 = vsyncadd (%p1280_p8), %s182_s29, 4294966784  ;;  %s191_s25 = scalar_lea.sflag [#allocation6], %s1108_s4  ;;  %s194_s7 = scalar_lea.vmem [#allocation5], %s523_s6 }
  0x53   : > { %886 = dma.done.wait (%p1280_p8), %s191_s25, 512  }
  0x54   : > { %888 = vsyncadd (%p1280_p8), %s191_s25, 4294966784  ;;  %v272_v0 = vlaneseq  ;;  %v244_v5 = vld [vmem:[%s194_s7] sm:$0xff]  ;;  %v245_v6 = vld [vmem:[%s194_s7 + $0x8] sm:$0xff]  ;;  %s525_s8 = sshll.u32 %s1108_s4, 7  ;;  %v921_v11 = vmov 0.0   ;;  %s558_s18 = sshll.u32 %s907_s12, 11 }
  0x55   : > { %v246_v7 = vld [vmem:[%s194_s7 + $0x10] sm:$0xff]  ;;  %v247_v8 = vld [vmem:[%s194_s7 + $0x18] sm:$0xff]  ;;  %v240_v9 = vld [vmem:[%s185_s5] sm:$0xff]  ;;  %s1130_s21 = scalar_lea.vmem [#allocation7], %s525_s8  ;;  %s1215_s3 = scalar_lea.hbm %s1270_s2, %s558_s18 }
  0x56   : > { %v273_v1 = vshrl.u32 %v272_v0, 7  ;;  %v275_v2 = vand.u32 127, %v272_v0  ;;  %v241_v10 = vld [vmem:[%s185_s5 + $0x8] sm:$0xff]  ;;  %v242_v13 = vld [vmem:[%s185_s5 + $0x10] sm:$0xff]  ;;  %v243_v14 = vld [vmem:[%s185_s5 + $0x18] sm:$0xff]  ;;  %s404_s19 = sshll.u32 %s1130_s21, 4  ;;  %s1217_s19 = int_to_ptr.vmem [resolvable:$true] %s404_s19 }
  0x57   : > { %v248_v15 = vmax.f32 %v240_v9, %v241_v10  ;;  %v249_v20 = vmax.f32 %v242_v13, %v243_v14  ;;  %s391_s12 = scalar_lea.sflag [#allocation4], %s1108_s4  ;;  %s829_s15 = scalar_lea.vmem %s1217_s19, 2048 }
  0x58   : > { %v276_v3 = vmul.u32 128, %v273_v1  ;;  %p830_p0 = scmp.ne.s32.totalorder %s1217_s19, %s829_s15  ;;  %p1287_p3 = scmp.ne.s32.totalorder %s1275_s22, 0 }
  0x59   : > { %v250_v21 = vmax.f32 %v248_v15, %v249_v20  ;;  %s922_s26 = smov [#allocation7]  }
  0x5a   : > { %v279_v4 = vadd.s32 %v276_v3, %v275_v2  ;;  %p831_p12 = pnand %p830_p0, %p1287_p3  ;;  %s833_s16 = sshll.u32 %s922_s26, 4  ;;  %s834_s16 = int_to_ptr.vmem [resolvable:$false] %s833_s16 }
  0x5b   : > { %v251_v22 = vsub.f32 %v240_v9, %v250_v21  ;;  %v252_v23 = vsub.f32 %v241_v10, %v250_v21  ;;  %v253_v24 = vsub.f32 %v242_v13, %v250_v21  ;;  %v254_v25 = vsub.f32 %v243_v14, %v250_v21  ;;  %s835_s20 = scalar_lea.vmem %s834_s16, 4096  ;;  %p836_p7 = scmp.lt.s32.totalorder %s1217_s19, %s834_s16 }
  0x5c   : > { %vm280_vm0 = vcmp.lt.s32.totalorder %v279_v4, 256  ;;  %p832_p13 = pneg %p831_p12  ;;  %p837_p10 = scmp.lt.s32.totalorder %s835_s20, %s829_s15 }
  0x5d   : > { %v526_v12 = vsel %vm280_vm0, 1.0, %v921_v11  ;;  %v255_v26 = vmul.f32 1.442695, %v251_v22  ;;  %v257_v27 = vmul.f32 1.442695, %v252_v23 }
  0x5e   : > { %v1122_v16 = vmul.f32 %v526_v12, %v244_v5  ;;  %v1124_v17 = vmul.f32 %v526_v12, %v245_v6  ;;  %v1126_v18 = vmul.f32 %v526_v12, %v246_v7  ;;  %v1128_v19 = vmul.f32 %v526_v12, %v247_v8  ;;  %p838_p9 = por %p837_p10, %p836_p7 }
  0x5f   : > { %v259_v28 = vmul.f32 1.442695, %v253_v24  ;;  %v261_v29 = vmul.f32 1.442695, %v254_v25  ;;  %735 = vpow2.f32 %v255_v26 }
  0x60   : > { %327 = vst [vmem:[%s1130_s21] sm:$0xff] %v1122_v16  ;;  %328 = vst [vmem:[%s1130_s21 + $0x8] sm:$0xff] %v1124_v17  ;;  %737 = vpow2.f32 %v257_v27  ;;  %p839_p11 = pnand %p838_p9, %p832_p13 }
  0x61   : > { %329 = vst [vmem:[%s1130_s21 + $0x10] sm:$0xff] %v1126_v18  ;;  %330 = vst [vmem:[%s1130_s21 + $0x18] sm:$0xff] %v1128_v19  ;;  %739 = vpow2.f32 %v259_v28 }
  0x62   : > { %741 = vpow2.f32 %v261_v29 }
  0x69   : > { %v736_v30 = vpop.eup %735 }
  0x6a   : > { %v738_v31 = vpop.eup %737 }
  0x6b   : > { %v740_v32 = vpop.eup %739  ;;  %v263_v33 = vadd.f32 %v738_v31, %v736_v30 }
  0x6c   : > { %v742_v34 = vpop.eup %741 }
  0x6d   : > { %v264_v35 = vadd.f32 %v740_v32, %v263_v33 }
  0x6f   : > { %v265_v36 = vadd.f32 %v742_v34, %v264_v35 }
  0x71   : > { %743 = vrcp.f32 %v265_v36 }
  0x7b   : > { %v744_v37 = vpop.eup %743 }
  0x7c   : > { %v267_v38 = vmul.f32 %v744_v37, %v736_v30  ;;  %v268_v39 = vmul.f32 %v744_v37, %v738_v31  ;;  %v269_v40 = vmul.f32 %v744_v37, %v740_v32  ;;  %v270_v41 = vmul.f32 %v744_v37, %v742_v34 }
  0x7e   : > { %v283_v42 = vmul.f32 %v526_v12, %v267_v38  ;;  %v284_v43 = vmul.f32 %v526_v12, %v268_v39  ;;  %v285_v44 = vmul.f32 %v526_v12, %v269_v40  ;;  %v286_v45 = vmul.f32 %v526_v12, %v270_v41 }
  0x80   : > { %v291_v46 = vmul.f32 0.98, %v283_v42  ;;  %v292_v47 = vmul.f32 0.98, %v284_v43  ;;  %v293_v48 = vmul.f32 0.98, %v285_v44  ;;  %v353_v52 = vmul.f32 %v1122_v16, %v283_v42 }
  0x81   : > { %v294_v49 = vmul.f32 0.98, %v286_v45  ;;  %531 = vst [vmem:[%s1130_s21 + $0x20] sm:$0xff] %v283_v42  ;;  %532 = vst [vmem:[%s1130_s21 + $0x28] sm:$0xff] %v284_v43  ;;  %v354_v53 = vmul.f32 %v1124_v17, %v284_v43  ;;  %v355_v56 = vmul.f32 %v1126_v18, %v285_v44  ;;  %v356_v57 = vmul.f32 %v1128_v19, %v286_v45 }
  0x82   : > { %v295_v50 = vadd.f32 0.01, %v291_v46  ;;  %v296_v51 = vadd.f32 0.01, %v292_v47  ;;  %v297_v54 = vadd.f32 0.01, %v293_v48 }
  0x83   : > { %533 = vst [vmem:[%s1130_s21 + $0x30] sm:$0xff] %v285_v44  ;;  %v298_v55 = vadd.f32 0.01, %v294_v49  ;;  %534 = vst [vmem:[%s1130_s21 + $0x38] sm:$0xff] %v286_v45 }
  0x84   : > { %745 = vlog2.f32 %v295_v50  ;;  %539 = vst [vmem:[%s1130_s21 + $0x40] sm:$0xff] %v353_v52  ;;  %540 = vst [vmem:[%s1130_s21 + $0x48] sm:$0xff] %v354_v53 }
  0x85   : > { %747 = vlog2.f32 %v296_v51  ;;  %541 = vst [vmem:[%s1130_s21 + $0x50] sm:$0xff] %v355_v56  ;;  %542 = vst [vmem:[%s1130_s21 + $0x58] sm:$0xff] %v356_v57 }
  0x86   : > { %749 = vlog2.f32 %v297_v54 }
  0x87   : > { %751 = vlog2.f32 %v298_v55 }
  0x8e   : > { %v746_v58 = vpop.eup %745 }
  0x8f   : > { %v748_v59 = vpop.eup %747  ;;  %v300_v60 = vmul.f32 0.6931472, %v746_v58 }
  0x90   : > { %v750_v61 = vpop.eup %749  ;;  %v302_v62 = vmul.f32 0.6931472, %v748_v59 }
  0x91   : > { %v752_v63 = vpop.eup %751  ;;  %v307_v0 = vsub.f32 0.0, %v300_v60  ;;  %v304_v1 = vmul.f32 0.6931472, %v750_v61 }
  0x92   : > { %v308_v2 = vsub.f32 0.0, %v302_v62  ;;  %v306_v3 = vmul.f32 0.6931472, %v752_v63 }
  0x93   : > { %v1152_v4 = vsub.f32 0.0, %v304_v1  ;;  %v563_v5 = vand.u32 2147483647, %v307_v0  ;;  %vm567_vm1 = vcmp.lt.f32.partialorder %v307_v0, 0  ;;  %vm568_vm2 = vcmp.eq.f32.partialorder %v307_v0, 0 }
  0x94   : > { %v1154_v6 = vsub.f32 0.0, %v306_v3  ;;  %v589_v7 = vand.u32 2147483647, %v308_v2  ;;  %vm569_vm3 = vcmp.eq.f32.partialorder %v307_v0, 1065353216  ;;  %vm580_vm4 = vcmp.ne.f32.partialorder %v307_v0, %v307_v0 }
  0x95   : > { %753 = vlog2.f32 %v563_v5  ;;  %v615_v8 = vand.u32 2147483647, %v1152_v4  ;;  %vm593_vm5 = vcmp.lt.f32.partialorder %v308_v2, 0  ;;  %vm1158_vm6 = vcmp.eq.f32.partialorder %v563_v5, 2139095040 }
  0x96   : > { %755 = vlog2.f32 %v589_v7  ;;  %v641_v9 = vand.u32 2147483647, %v1154_v6  ;;  %vm594_vm7 = vcmp.eq.f32.partialorder %v308_v2, 0  ;;  %vm595_vm8 = vcmp.eq.f32.partialorder %v308_v2, 1065353216 }
  0x97   : > { %757 = vlog2.f32 %v615_v8  ;;  %vm1162_vm9 = vcmp.eq.f32.partialorder %v589_v7, 2139095040  ;;  %vm606_vm10 = vcmp.ne.f32.partialorder %v308_v2, %v308_v2  ;;  %vm619_vm11 = vcmp.lt.f32.partialorder %v1152_v4, 0 }
  0x98   : > { %759 = vlog2.f32 %v641_v9  ;;  %vm620_vm12 = vcmp.eq.f32.partialorder %v1152_v4, 0  ;;  %vm621_vm13 = vcmp.eq.f32.partialorder %v1152_v4, 1065353216  ;;  %vm632_vm14 = vcmp.ne.f32.partialorder %v1152_v4, %v1152_v4 }
  0x99   : > { %vm645_vm15 = vcmp.lt.f32.partialorder %v1154_v6, 0  ;;  %vm646_vm0 = vcmp.eq.f32.partialorder %v1154_v6, 0 }
  0x9f   : > { %v754_v10 = vpop.eup %753 }
  0xa0   : > { %v756_v11 = vpop.eup %755  ;;  %v565_v12 = vmul.f32 0.3, %v754_v10 }
  0xa1   : > { %v591_v13 = vmul.f32 0.3, %v756_v11  ;;  %v758_v14 = vpop.eup %757 }
  0xa2   : > { %761 = vpow2.f32 %v565_v12  ;;  %v760_v15 = vpop.eup %759  ;;  %v617_v20 = vmul.f32 0.3, %v758_v14 }
  0xa3   : > { %763 = vpow2.f32 %v591_v13  ;;  %v643_v21 = vmul.f32 0.3, %v760_v15 }
  0xa4   : > { %765 = vpow2.f32 %v617_v20 }
  0xa5   : > { %767 = vpow2.f32 %v643_v21 }
  0xac   : > { %v762_v22 = vpop.eup %761 }
  0xad   : > { %v764_v25 = vpop.eup %763  ;;  %v573_v26 = vsel %vm567_vm1, 2143289344, %v762_v22  ;;  %vm1178_vm1 = vcmp.eq.f32.partialorder %v615_v8, 2139095040 }
  0xae   : > { %v574_v27 = vsel %vm568_vm2, 0, %v573_v26  ;;  %v599_v28 = vsel %vm593_vm5, 2143289344, %v764_v25  ;;  %v766_v31 = vpop.eup %765  ;;  %vm658_vm2 = vcmp.ne.f32.partialorder %v1154_v6, %v1154_v6 }
  0xaf   : > { %v579_v29 = vsel %vm1158_vm6, 2139095040, %v574_v27  ;;  %v600_v30 = vsel %vm594_vm7, 0, %v599_v28  ;;  %v768_v35 = vpop.eup %767  ;;  %v625_v38 = vsel %vm619_vm11, 2143289344, %v766_v31 }
  0xb0   : > { %v583_v32 = vsel %vm580_vm4, 2143289344, %v579_v29  ;;  %v605_v33 = vsel %vm1162_vm9, 2139095040, %v600_v30  ;;  %vm650_vm4 = vcmp.eq.f32.partialorder %v641_v9, 2139095040  ;;  %v626_v41 = vsel %vm620_vm12, 0, %v625_v38 }
  0xb1   : > { %v584_v36 = vsel %vm569_vm3, 1065353216, %v583_v32  ;;  %v609_v37 = vsel %vm606_vm10, 2143289344, %v605_v33  ;;  %v651_v42 = vsel %vm645_vm15, 2143289344, %v768_v35  ;;  %v631_v44 = vsel %vm1178_vm1, 2139095040, %v626_v41 }
  0xb2   : > { %v374_v39 = vmul.f32 %v584_v36, %v1122_v16  ;;  %v610_v40 = vsel %vm595_vm8, 1065353216, %v609_v37  ;;  %vm647_vm3 = vcmp.eq.f32.partialorder %v1154_v6, 1065353216  ;;  %v652_v45 = vsel %vm646_vm0, 0, %v651_v42 }
  0xb3   : > { %v375_v43 = vmul.f32 %v610_v40, %v1124_v17  ;;  %v635_v16 = vsel %vm632_vm14, 2143289344, %v631_v44  ;;  %v657_v46 = vsel %vm650_vm4, 2139095040, %v652_v45 }
  0xb4   : > { %v636_v47 = vsel %vm621_vm13, 1065353216, %v635_v16  ;;  %v661_v17 = vsel %vm658_vm2, 2143289344, %v657_v46  ;;  %547 = vst [vmem:[%s1130_s21 + $0x60] sm:$0xff] %v374_v39 }
  0xb5   : > { %v376_v48 = vmul.f32 %v636_v47, %v1126_v18  ;;  %v662_v49 = vsel %vm647_vm3, 1065353216, %v661_v17  ;;  %548 = vst [vmem:[%s1130_s21 + $0x68] sm:$0xff] %v375_v43 }
  0xb6   : > { %v377_v50 = vmul.f32 %v662_v49, %v1128_v19 }
  0xb7   : > { %549 = vst [vmem:[%s1130_s21 + $0x70] sm:$0xff] %v376_v48 }
  0xb8   : > { %550 = vst [vmem:[%s1130_s21 + $0x78] sm:$0xff] %v377_v50 }
  0xb9   : > { %842 = shalt.err (!%p839_p11)
}
  0xba   : > { %s843_s27 = scalar_lea.hbm %s1215_s3, 2048  ;;  %s847_s5 = scalar_lea.hbm %s1270_s2, 4096 }
  0xbb   : > { %p844_p1 = scmp.ne.s32.totalorder %s1215_s3, %s843_s27  ;;  %p848_p5 = scmp.lt.u32.totalorder %s1215_s3, %s1270_s2 }
  0xbc   : > { %p849_p4 = scmp.lt.u32.totalorder %s847_s5, %s843_s27  ;;  %p851_p0 = scmp.lt.u32.totalorder %s843_s27, %s1215_s3 }
  0xbd   : > { %p845_p6 = pnand %p844_p1, %p1287_p3 }
  0xbe   : > { %p850_p8 = por %p849_p4, %p848_p5 }
  0xbf   : > { %p846_p2 = pneg %p845_p6 }
  0xc0   : > { %p852_p12 = por %p851_p0, %p850_p8 }
  0xc2   : > { %p853_p13 = pnand %p852_p12, %p846_p2 }
  0xc4   : > { %856 = shalt.err (!%p853_p13)
}
  0xc5   : > { %s923_s8 = smov 128   ;;  %s924_s21 = smov 8  }
  0xc6   : > { %667 = dma.vmem_to_hbm [thread:$0]  (%p1287_p3), %s1217_s19, 2048, %s1215_s3, %s391_s12, %s923_s8, %s923_s8, %s924_s21  }
  0xc7 PF: > { %s419_s18 = sand.u32 1, %s895_s9   ;;  %p1288_p7 = scmp.ne.s32.totalorder %s1276_s24, 0 }
  0xc8   : > { %p1289_p10 = scmp.ge.s32.totalorder %s915_s14, 2  ;;  %s420_s28 = scalar_lea.sflag [#allocation4], %s419_s18 }
  0xca   : > { %p677_p9 = pnand %p1289_p10, %p1288_p7 }
  0xcc   : > { %890 = dma.done.wait (!%p677_p9), %s420_s28, 2048  }
  0xcd   : > { %892 = vsyncadd (!%p677_p9), %s420_s28, 4294965248  ;;  %s21_s14 = sadd.s32 1, %s915_s14   ;;  %s1290_s9 = smov %s899_s10 }
  0xce   : > { %p18_p11 = scmp.ge.s32.totalorder %s21_s14, 4   ;;  %s1291_s10 = smov %s903_s11 }
  0xcf   : > { %s1292_s11 = smov %s996_s23  ;;  %s1293_s12 = smov %s911_s13 }
  0xd0   : > { %s1294_s13 = smov %s1296_s17  ;;  %20 = sbr.rel (!%p18_p11) target bundleno = 8 (0x8), region = 93 }
  0xd7   :  { %425 = vsyncpa [#allocation3], 1 }
  0xd8   :  { %427 = vsyncpa [#allocation3 + $0x1], 1 }
  0xd9   :  { %428 = vsyncpa [#allocation6], 1 }
  0xda   :  { %430 = vsyncpa [#allocation6 + $0x1], 1 }
  0xdb   :  { %431 = vsyncpa [#allocation4], 1 }
  0xdc   :  { %433 = vsyncpa [#allocation4 + $0x1], 1 }

</bundles_post_ra>
